<compile_context>
chip_gen: v5e
topology: v5e:2x2
jax: 0.10.0
libtpu: 0.0.40
codegen_flags: <defaults>
</compile_context>

<pallas_src>
import functools

import jax
import jax.numpy as jnp
from jax.experimental import pallas as pl
from jax.experimental.pallas import tpu as pltpu


def _round_up(n, m):
    return ((n + m - 1) // m) * m


@functools.lru_cache(maxsize=1)
def _physical_vmem_bytes():
    try:
        return int(pltpu.get_tpu_info().vmem_capacity_bytes)
    except Exception:
        return 64 * 1024 * 1024  # conservative (v7x-sized) default


@functools.lru_cache(maxsize=1)
def _tensorcores_per_chip():
    """Best-effort TC-per-chip query; defaults to 1 (no batch split)."""
    try:
        info = pltpu.get_tpu_info()
        for attr in ("num_cores", "cores_per_chip", "num_tensorcores", "tensorcore_count"):
            v = getattr(info, attr, None)
            if v:
                return int(v)
    except Exception:
        pass
    try:
        kind = jax.devices()[0].device_kind.lower()
        if "v7" in kind or "v4" in kind or "v5p" in kind:
            return 2
    except Exception:
        pass
    return 1


def actor_kernel(x_ref, w1_ref, b1_ref, w2_ref, b2_ref, w3_ref, b3_ref, o_ref):
    """Fused 3-layer MLP for one batch tile.

    Matmuls accumulate in f32 on the MXU; operands stay in the prepared dtype
    (f32 or bf16). Biases / epilogue stay in f32.
    """
    h = jnp.dot(x_ref[...], w1_ref[...], preferred_element_type=jnp.float32) + b1_ref[...]
    h = jnp.maximum(h, 0.0).astype(w2_ref.dtype)                       # relu

    h = jnp.dot(h, w2_ref[...], preferred_element_type=jnp.float32) + b2_ref[...]
    h = jnp.maximum(h, 0.0).astype(w3_ref.dtype)                       # relu

    h = jnp.dot(h, w3_ref[...], preferred_element_type=jnp.float32) + b3_ref[...]
    # sigmoid(2h) == (tanh(h) + 1) / 2  -- same math, fewer VALU ops in the epilogue.
    o_ref[...] = jax.nn.sigmoid(2.0 * h).astype(o_ref.dtype)           # in [0, 1]


def prepare_actor_params(w1, b1, w2, b2, w3, b3, *, compute_dtype=None):
    """Pad hidden/output feature dims to 128 lanes and cast ONCE (setup time).

    Zero-padded columns are inert through relu (bias pads are 0) and the padded
    output columns are sliced off after the kernel.
    """
    in_dim, hidden = w1.shape
    out_dim = w3.shape[1]
    cdt = jnp.dtype(compute_dtype) if compute_dtype is not None else jnp.dtype(w1.dtype)
    h_pad = _round_up(hidden, 128)
    o_pad = _round_up(out_dim, 128)

    def pad_to(a, rows, cols):
        return jnp.pad(a, ((0, rows - a.shape[0]), (0, cols - a.shape[1])))

    return {
        "w1": pad_to(w1, in_dim, h_pad).astype(cdt),
        "b1": pad_to(b1.reshape(1, -1), 1, h_pad).astype(jnp.float32),
        "w2": pad_to(w2, h_pad, h_pad).astype(cdt),
        "b2": pad_to(b2.reshape(1, -1), 1, h_pad).astype(jnp.float32),
        "w3": pad_to(w3, h_pad, o_pad).astype(cdt),
        "b3": pad_to(b3.reshape(1, -1), 1, o_pad).astype(jnp.float32),
        "out_dim": out_dim,
    }


@functools.partial(
    jax.jit, static_argnames=("out_dim", "block_b", "single_buffer_weights"))
def _actor_forward(state, w1p, b1p, w2p, b2p, w3p, b3p, *,
                   out_dim, block_b, single_buffer_weights):
    B, in_dim = state.shape
    h_pad = w1p.shape[1]
    o_pad = w3p.shape[1]
    cdt = w1p.dtype
    out_dtype = state.dtype
    xc = state.astype(cdt)  # activations only; weights are pre-cast/pre-padded

    # ---- batch tiling (generation-aware) ------------------------------------
    sublane = 16 if cdt == jnp.bfloat16 else 8
    if B > block_b:
        tb = max(sublane, (block_b // sublane) * sublane)
    elif _tensorcores_per_chip() >= 2 and 2 * sublane <= B:
        # Split only where a second TensorCore can pick up the other tile (v7x).
        tb = _round_up(pl.cdiv(B, 2), sublane)
    else:
        tb = B  # single full-extent tile: no extra serial grid step, no ragged tail
    grid = (pl.cdiv(B, tb),)

    # ---- VMEM budget (no double counting; capped at 3/4 of physical VMEM) ----
    isz = jnp.dtype(cdt).itemsize
    osz = jnp.dtype(out_dtype).itemsize
    wbuf = 1 if single_buffer_weights else 2
    weight_bytes = (in_dim * h_pad + h_pad * h_pad + h_pad * o_pad) * isz
    bias_bytes = (2 * h_pad + o_pad) * 4
    io_tile_bytes = 2 * tb * in_dim * isz + 2 * tb * o_pad * osz   # double-buffered IO
    tmp_bytes = 3 * tb * h_pad * 4                                  # f32 intermediates
    footprint = wbuf * (weight_bytes + bias_bytes) + io_tile_bytes + tmp_bytes
    vmem_limit = int(min(3 * _physical_vmem_bytes() // 4,
                         max(16 * 1024 * 1024, (footprint * 5) // 4)))

    cost = pl.CostEstimate(
        flops=2 * B * (in_dim * h_pad + h_pad * h_pad + h_pad * o_pad),
        transcendentals=B * o_pad,
        bytes_accessed=(B * in_dim * isz + weight_bytes + bias_bytes + B * o_pad * osz),
    )

    # Weights/biases: constant-index blocks resident across all batch tiles;
    # single-buffer them (their index_map never changes) when supported.
    def const_spec(shape):
        if single_buffer_weights:
            try:
                return pl.BlockSpec(shape, lambda i: (0, 0),
                                    pipeline_mode=pl.Buffered(1))
            except Exception:
                pass
        return pl.BlockSpec(shape, lambda i: (0, 0))

    out_padded = pl.pallas_call(
        actor_kernel,
        out_shape=jax.ShapeDtypeStruct((B, o_pad), out_dtype),
        grid_spec=pltpu.PrefetchScalarGridSpec(
            num_scalar_prefetch=0,
            grid=grid,
            in_specs=[
                pl.BlockSpec((tb, in_dim), lambda i: (i, 0)),   # state tile (K unpadded)
                const_spec((in_dim, h_pad)),                    # W1
                const_spec((1, h_pad)),                         # b1
                const_spec((h_pad, h_pad)),                     # W2
                const_spec((1, h_pad)),                         # b2
                const_spec((h_pad, o_pad)),                     # W3
                const_spec((1, o_pad)),                         # b3
            ],
            out_specs=pl.BlockSpec((tb, o_pad), lambda i: (i, 0)),
        ),
        compiler_params=pltpu.CompilerParams(
            dimension_semantics=("parallel",),
            vmem_limit_bytes=vmem_limit,
        ),
        cost_estimate=cost,
    )(xc, w1p, b1p, w2p, b2p, w3p, b3p)

    return out_padded[:, :out_dim]


_SINGLE_BUFFER_OK = None  # discovered on first call; cached afterwards


def actor_forward(state, params, *, block_b=512):
    """Actor forward: state (B, in) -> action in [0, 1] (B, out)."""
    global _SINGLE_BUFFER_OK
    args = (state, params["w1"], params["b1"], params["w2"], params["b2"],
            params["w3"], params["b3"])
    kwargs = dict(out_dim=params["out_dim"], block_b=block_b)
    if _SINGLE_BUFFER_OK is None:
        try:
            out = jax.block_until_ready(
                _actor_forward(*args, single_buffer_weights=True, **kwargs))
            _SINGLE_BUFFER_OK = True
            return out
        except Exception:
            _SINGLE_BUFFER_OK = False
    return _actor_forward(*args, single_buffer_weights=_SINGLE_BUFFER_OK, **kwargs)


def init_linear(key, in_features, out_features, dtype=jnp.float32):
    """Deterministic init mimicking torch.nn.Linear default (uniform +/- 1/sqrt(in))."""
    kw, kb = jax.random.split(key)
    bound = 1.0 / (in_features ** 0.5)
    # Stored as (in, out) so the kernel does x @ W.
    w = jax.random.uniform(kw, (in_features, out_features), dtype, -bound, bound)
    b = jax.random.uniform(kb, (1, out_features), dtype, -bound, bound)
    return w, b


def reference_forward(state, w1, b1, w2, b2, w3, b3):
    x = jnp.maximum(state @ w1 + b1, 0.0)
    x = jnp.maximum(x @ w2 + b2, 0.0)
    x = jnp.tanh(x @ w3 + b3)
    return (x + 1.0) / 2.0


if __name__ == "__main__":
    # Small shapes consistent with the module: batch=2, input=16, hidden=32, output=8
    B, INPUT, HIDDEN, OUTPUT = 2, 16, 32, 8

    key = jax.random.PRNGKey(0)
    k_state, k1, k2, k3 = jax.random.split(key, 4)

    state = jax.random.normal(k_state, (B, INPUT), jnp.float32)
    w1, b1 = init_linear(k1, INPUT, HIDDEN)
    w2, b2 = init_linear(k2, HIDDEN, HIDDEN)
    w3, b3 = init_linear(k3, HIDDEN, OUTPUT)

    ref = reference_forward(state, w1, b1, w2, b2, w3, b3)

    # f32 path: matches the PyTorch module semantics tightly.
    params = prepare_actor_params(w1, b1, w2, b2, w3, b3)
    out = jax.block_until_ready(actor_forward(state, params))
    assert out.shape == (B, OUTPUT), out.shape
    assert jnp.allclose(out, ref, atol=1e-5, rtol=1e-5), (
        f"max abs err {jnp.max(jnp.abs(out - ref))}"
    )
    assert bool(jnp.all((out >= 0.0) & (out <= 1.0)))

    # bf16 operand path (MXU-native, halved operand traffic): looser tolerance.
    params_bf16 = prepare_actor_params(w1, b1, w2, b2, w3, b3, compute_dtype="bfloat16")
    out_bf16 = jax.block_until_ready(actor_forward(state, params_bf16))
    assert out_bf16.shape == (B, OUTPUT)
    assert jnp.allclose(out_bf16, ref, atol=5e-2, rtol=5e-2), (
        f"bf16 max abs err {jnp.max(jnp.abs(out_bf16 - ref))}"
    )

    # Larger batch: single full-extent tile on 1-TC chips, 2 tiles on v7x megacore.
    B2 = 300
    state2 = jax.random.normal(k_state, (B2, INPUT), jnp.float32)
    out2 = jax.block_until_ready(actor_forward(state2, params))
    ref2 = reference_forward(state2, w1, b1, w2, b2, w3, b3)
    assert out2.shape == (B2, OUTPUT)
    assert jnp.allclose(out2, ref2, atol=1e-5, rtol=1e-5), (
        f"max abs err {jnp.max(jnp.abs(out2 - ref2))}"
    )

    print("KERNEL_OK")
</pallas_src>

<mosaic_0001>
module attributes {stable_mosaic.version = 11 : i64} {
  func.func @actor_kernel(%arg0: i32, %arg1: memref<2x16xf32, #tpu.memory_space<vmem>>, %arg2: memref<16x128xf32, #tpu.memory_space<vmem>>, %arg3: memref<1x128xf32, #tpu.memory_space<vmem>>, %arg4: memref<128x128xf32, #tpu.memory_space<vmem>>, %arg5: memref<1x128xf32, #tpu.memory_space<vmem>>, %arg6: memref<128x128xf32, #tpu.memory_space<vmem>>, %arg7: memref<1x128xf32, #tpu.memory_space<vmem>>, %arg8: memref<2x128xf32, #tpu.memory_space<vmem>>) attributes {dimension_semantics = [#tpu.dimension_semantics<parallel>], iteration_bounds = array<i64: 1>, scalar_prefetch = 0 : i64, scratch_operands = 0 : i64, tpu.core_type = #tpu.core_type<tc>, window_params = [{transform_indices = @transform_0, window_bounds = array<i64: 2, 16>}, {pipeline_mode = #tpu.pipeline_mode<synchronous>, transform_indices = @transform_1, window_bounds = array<i64: 16, 128>}, {pipeline_mode = #tpu.pipeline_mode<synchronous>, transform_indices = @transform_2, window_bounds = array<i64: 1, 128>}, {pipeline_mode = #tpu.pipeline_mode<synchronous>, transform_indices = @transform_3, window_bounds = array<i64: 128, 128>}, {pipeline_mode = #tpu.pipeline_mode<synchronous>, transform_indices = @transform_4, window_bounds = array<i64: 1, 128>}, {pipeline_mode = #tpu.pipeline_mode<synchronous>, transform_indices = @transform_5, window_bounds = array<i64: 128, 128>}, {pipeline_mode = #tpu.pipeline_mode<synchronous>, transform_indices = @transform_6, window_bounds = array<i64: 1, 128>}, {transform_indices = @transform_7, window_bounds = array<i64: 2, 128>}]} {
    %c0 = arith.constant 0 : index
    %c0_0 = arith.constant 0 : index
    %0 = vector.load %arg1[%c0, %c0_0] : memref<2x16xf32, #tpu.memory_space<vmem>>, vector<2x16xf32>
    %c0_1 = arith.constant 0 : index
    %c0_2 = arith.constant 0 : index
    %1 = vector.load %arg2[%c0_1, %c0_2] : memref<16x128xf32, #tpu.memory_space<vmem>>, vector<16x128xf32>
    %cst = arith.constant dense<0.000000e+00> : vector<2x128xf32>
    %2 = tpu.matmul %0, %1, %cst {dimension_numbers = #tpu.dot_dimension_numbers<[1], [0], [0], [1], [0, 0, 1, 1], [], []>} : vector<2x16xf32>, vector<16x128xf32>, vector<2x128xf32> -> vector<2x128xf32>
    %c0_3 = arith.constant 0 : index
    %c0_4 = arith.constant 0 : index
    %3 = vector.load %arg3[%c0_3, %c0_4] : memref<1x128xf32, #tpu.memory_space<vmem>>, vector<1x128xf32>
    %4 = vector.broadcast %3 : vector<1x128xf32> to vector<2x128xf32>
    %5 = arith.addf %2, %4 : vector<2x128xf32>
    %cst_5 = arith.constant 0.000000e+00 : f32
    %6 = vector.broadcast %cst_5 : f32 to vector<2x128xf32>
    %7 = arith.maximumf %5, %6 : vector<2x128xf32>
    %c0_6 = arith.constant 0 : index
    %c0_7 = arith.constant 0 : index
    %8 = vector.load %arg4[%c0_6, %c0_7] : memref<128x128xf32, #tpu.memory_space<vmem>>, vector<128x128xf32>
    %cst_8 = arith.constant dense<0.000000e+00> : vector<2x128xf32>
    %9 = tpu.matmul %7, %8, %cst_8 {dimension_numbers = #tpu.dot_dimension_numbers<[1], [0], [0], [1], [0, 0, 1, 1], [], []>} : vector<2x128xf32>, vector<128x128xf32>, vector<2x128xf32> -> vector<2x128xf32>
    %c0_9 = arith.constant 0 : index
    %c0_10 = arith.constant 0 : index
    %10 = vector.load %arg5[%c0_9, %c0_10] : memref<1x128xf32, #tpu.memory_space<vmem>>, vector<1x128xf32>
    %11 = vector.broadcast %10 : vector<1x128xf32> to vector<2x128xf32>
    %12 = arith.addf %9, %11 : vector<2x128xf32>
    %cst_11 = arith.constant 0.000000e+00 : f32
    %13 = vector.broadcast %cst_11 : f32 to vector<2x128xf32>
    %14 = arith.maximumf %12, %13 : vector<2x128xf32>
    %c0_12 = arith.constant 0 : index
    %c0_13 = arith.constant 0 : index
    %15 = vector.load %arg6[%c0_12, %c0_13] : memref<128x128xf32, #tpu.memory_space<vmem>>, vector<128x128xf32>
    %cst_14 = arith.constant dense<0.000000e+00> : vector<2x128xf32>
    %16 = tpu.matmul %14, %15, %cst_14 {dimension_numbers = #tpu.dot_dimension_numbers<[1], [0], [0], [1], [0, 0, 1, 1], [], []>} : vector<2x128xf32>, vector<128x128xf32>, vector<2x128xf32> -> vector<2x128xf32>
    %c0_15 = arith.constant 0 : index
    %c0_16 = arith.constant 0 : index
    %17 = vector.load %arg7[%c0_15, %c0_16] : memref<1x128xf32, #tpu.memory_space<vmem>>, vector<1x128xf32>
    %18 = vector.broadcast %17 : vector<1x128xf32> to vector<2x128xf32>
    %19 = arith.addf %16, %18 : vector<2x128xf32>
    %cst_17 = arith.constant 2.000000e+00 : f32
    %20 = vector.broadcast %cst_17 : f32 to vector<2x128xf32>
    %21 = arith.mulf %20, %19 : vector<2x128xf32>
    %22 = arith.negf %21 : vector<2x128xf32>
    %23 = math.exp %22 : vector<2x128xf32>
    %cst_18 = arith.constant 1.000000e+00 : f32
    %24 = vector.broadcast %cst_18 : f32 to vector<2x128xf32>
    %25 = arith.addf %24, %23 : vector<2x128xf32>
    %26 = arith.divf %24, %25 : vector<2x128xf32>
    %c0_19 = arith.constant 0 : index
    %c0_20 = arith.constant 0 : index
    %27 = vector.load %arg8[%c0_19, %c0_20] : memref<2x128xf32, #tpu.memory_space<vmem>>, vector<2x128xf32>
    tpu.vector_store %arg8[%c0_19, %c0_20], %26 {strides = array<i32>} : memref<2x128xf32, #tpu.memory_space<vmem>>, vector<2x128xf32>,
    return
  }
  func.func @transform_0(%arg0: i32) -> (i32, i32) {
    %c0_i32 = arith.constant 0 : i32
    %c0_i32_0 = arith.constant 0 : i32
    return %arg0, %c0_i32 : i32, i32
  }
  func.func @transform_1(%arg0: i32) -> (i32, i32) {
    %c0_i32 = arith.constant 0 : i32
    %c0_i32_0 = arith.constant 0 : i32
    %c0_i32_1 = arith.constant 0 : i32
    return %c0_i32, %c0_i32_0 : i32, i32
  }
  func.func @transform_2(%arg0: i32) -> (i32, i32) {
    %c0_i32 = arith.constant 0 : i32
    %c0_i32_0 = arith.constant 0 : i32
    %c0_i32_1 = arith.constant 0 : i32
    return %c0_i32, %c0_i32_0 : i32, i32
  }
  func.func @transform_3(%arg0: i32) -> (i32, i32) {
    %c0_i32 = arith.constant 0 : i32
    %c0_i32_0 = arith.constant 0 : i32
    %c0_i32_1 = arith.constant 0 : i32
    return %c0_i32, %c0_i32_0 : i32, i32
  }
  func.func @transform_4(%arg0: i32) -> (i32, i32) {
    %c0_i32 = arith.constant 0 : i32
    %c0_i32_0 = arith.constant 0 : i32
    %c0_i32_1 = arith.constant 0 : i32
    return %c0_i32, %c0_i32_0 : i32, i32
  }
  func.func @transform_5(%arg0: i32) -> (i32, i32) {
    %c0_i32 = arith.constant 0 : i32
    %c0_i32_0 = arith.constant 0 : i32
    %c0_i32_1 = arith.constant 0 : i32
    return %c0_i32, %c0_i32_0 : i32, i32
  }
  func.func @transform_6(%arg0: i32) -> (i32, i32) {
    %c0_i32 = arith.constant 0 : i32
    %c0_i32_0 = arith.constant 0 : i32
    %c0_i32_1 = arith.constant 0 : i32
    return %c0_i32, %c0_i32_0 : i32, i32
  }
  func.func @transform_7(%arg0: i32) -> (i32, i32) {
    %c0_i32 = arith.constant 0 : i32
    %c0_i32_0 = arith.constant 0 : i32
    return %arg0, %c0_i32 : i32, i32
  }
}

module attributes {stable_mosaic.version = 11 : i64} {
  func.func @actor_kernel(%arg0: i32, %arg1: memref<2x16xf32, #tpu.memory_space<vmem>>, %arg2: memref<16x128xf32, #tpu.memory_space<vmem>>, %arg3: memref<1x128xf32, #tpu.memory_space<vmem>>, %arg4: memref<128x128xf32, #tpu.memory_space<vmem>>, %arg5: memref<1x128xf32, #tpu.memory_space<vmem>>, %arg6: memref<128x128xf32, #tpu.memory_space<vmem>>, %arg7: memref<1x128xf32, #tpu.memory_space<vmem>>, %arg8: memref<2x128xf32, #tpu.memory_space<vmem>>) attributes {dimension_semantics = [#tpu.dimension_semantics<parallel>], iteration_bounds = array<i64: 1>, scalar_prefetch = 0 : i64, scratch_operands = 0 : i64, tpu.core_type = #tpu.core_type<tc>, window_params = [{transform_indices = @transform_0, window_bounds = array<i64: 2, 16>}, {pipeline_mode = #tpu.pipeline_mode<synchronous>, transform_indices = @transform_1, window_bounds = array<i64: 16, 128>}, {pipeline_mode = #tpu.pipeline_mode<synchronous>, transform_indices = @transform_2, window_bounds = array<i64: 1, 128>}, {pipeline_mode = #tpu.pipeline_mode<synchronous>, transform_indices = @transform_3, window_bounds = array<i64: 128, 128>}, {pipeline_mode = #tpu.pipeline_mode<synchronous>, transform_indices = @transform_4, window_bounds = array<i64: 1, 128>}, {pipeline_mode = #tpu.pipeline_mode<synchronous>, transform_indices = @transform_5, window_bounds = array<i64: 128, 128>}, {pipeline_mode = #tpu.pipeline_mode<synchronous>, transform_indices = @transform_6, window_bounds = array<i64: 1, 128>}, {transform_indices = @transform_7, window_bounds = array<i64: 2, 128>}]} {
    %c0 = arith.constant 0 : index
    %c0_0 = arith.constant 0 : index
    %0 = vector.load %arg1[%c0, %c0_0] : memref<2x16xf32, #tpu.memory_space<vmem>>, vector<2x16xf32>
    %c0_1 = arith.constant 0 : index
    %c0_2 = arith.constant 0 : index
    %1 = vector.load %arg2[%c0_1, %c0_2] : memref<16x128xf32, #tpu.memory_space<vmem>>, vector<16x128xf32>
    %cst = arith.constant dense<0.000000e+00> : vector<2x128xf32>
    %2 = tpu.matmul %0, %1, %cst {dimension_numbers = #tpu.dot_dimension_numbers<[1], [0], [0], [1], [0, 0, 1, 1], [], []>} : vector<2x16xf32>, vector<16x128xf32>, vector<2x128xf32> -> vector<2x128xf32>
    %c0_3 = arith.constant 0 : index
    %c0_4 = arith.constant 0 : index
    %3 = vector.load %arg3[%c0_3, %c0_4] : memref<1x128xf32, #tpu.memory_space<vmem>>, vector<1x128xf32>
    %4 = vector.broadcast %3 : vector<1x128xf32> to vector<2x128xf32>
    %5 = arith.addf %2, %4 : vector<2x128xf32>
    %cst_5 = arith.constant 0.000000e+00 : f32
    %6 = vector.broadcast %cst_5 : f32 to vector<2x128xf32>
    %7 = arith.maximumf %5, %6 : vector<2x128xf32>
    %c0_6 = arith.constant 0 : index
    %c0_7 = arith.constant 0 : index
    %8 = vector.load %arg4[%c0_6, %c0_7] : memref<128x128xf32, #tpu.memory_space<vmem>>, vector<128x128xf32>
    %cst_8 = arith.constant dense<0.000000e+00> : vector<2x128xf32>
    %9 = tpu.matmul %7, %8, %cst_8 {dimension_numbers = #tpu.dot_dimension_numbers<[1], [0], [0], [1], [0, 0, 1, 1], [], []>} : vector<2x128xf32>, vector<128x128xf32>, vector<2x128xf32> -> vector<2x128xf32>
    %c0_9 = arith.constant 0 : index
    %c0_10 = arith.constant 0 : index
    %10 = vector.load %arg5[%c0_9, %c0_10] : memref<1x128xf32, #tpu.memory_space<vmem>>, vector<1x128xf32>
    %11 = vector.broadcast %10 : vector<1x128xf32> to vector<2x128xf32>
    %12 = arith.addf %9, %11 : vector<2x128xf32>
    %cst_11 = arith.constant 0.000000e+00 : f32
    %13 = vector.broadcast %cst_11 : f32 to vector<2x128xf32>
    %14 = arith.maximumf %12, %13 : vector<2x128xf32>
    %c0_12 = arith.constant 0 : index
    %c0_13 = arith.constant 0 : index
    %15 = vector.load %arg6[%c0_12, %c0_13] : memref<128x128xf32, #tpu.memory_space<vmem>>, vector<128x128xf32>
    %cst_14 = arith.constant dense<0.000000e+00> : vector<2x128xf32>
    %16 = tpu.matmul %14, %15, %cst_14 {dimension_numbers = #tpu.dot_dimension_numbers<[1], [0], [0], [1], [0, 0, 1, 1], [], []>} : vector<2x128xf32>, vector<128x128xf32>, vector<2x128xf32> -> vector<2x128xf32>
    %c0_15 = arith.constant 0 : index
    %c0_16 = arith.constant 0 : index
    %17 = vector.load %arg7[%c0_15, %c0_16] : memref<1x128xf32, #tpu.memory_space<vmem>>, vector<1x128xf32>
    %18 = vector.broadcast %17 : vector<1x128xf32> to vector<2x128xf32>
    %19 = arith.addf %16, %18 : vector<2x128xf32>
    %cst_17 = arith.constant 2.000000e+00 : f32
    %20 = vector.broadcast %cst_17 : f32 to vector<2x128xf32>
    %21 = arith.mulf %20, %19 : vector<2x128xf32>
    %22 = arith.negf %21 : vector<2x128xf32>
    %23 = math.exp %22 : vector<2x128xf32>
    %cst_18 = arith.constant 1.000000e+00 : f32
    %24 = vector.broadcast %cst_18 : f32 to vector<2x128xf32>
    %25 = arith.addf %24, %23 : vector<2x128xf32>
    %26 = arith.divf %24, %25 : vector<2x128xf32>
    %c0_19 = arith.constant 0 : index
    %c0_20 = arith.constant 0 : index
    %27 = vector.load %arg8[%c0_19, %c0_20] : memref<2x128xf32, #tpu.memory_space<vmem>>, vector<2x128xf32>
    tpu.vector_store %arg8[%c0_19, %c0_20], %26 {strides = array<i32>} : memref<2x128xf32, #tpu.memory_space<vmem>>, vector<2x128xf32>,
    return
  }
  func.func @transform_0(%arg0: i32) -> (i32, i32) {
    %c0_i32 = arith.constant 0 : i32
    %c0_i32_0 = arith.constant 0 : i32
    return %arg0, %c0_i32 : i32, i32
  }
  func.func @transform_1(%arg0: i32) -> (i32, i32) {
    %c0_i32 = arith.constant 0 : i32
    %c0_i32_0 = arith.constant 0 : i32
    %c0_i32_1 = arith.constant 0 : i32
    return %c0_i32, %c0_i32_0 : i32, i32
  }
  func.func @transform_2(%arg0: i32) -> (i32, i32) {
    %c0_i32 = arith.constant 0 : i32
    %c0_i32_0 = arith.constant 0 : i32
    %c0_i32_1 = arith.constant 0 : i32
    return %c0_i32, %c0_i32_0 : i32, i32
  }
  func.func @transform_3(%arg0: i32) -> (i32, i32) {
    %c0_i32 = arith.constant 0 : i32
    %c0_i32_0 = arith.constant 0 : i32
    %c0_i32_1 = arith.constant 0 : i32
    return %c0_i32, %c0_i32_0 : i32, i32
  }
  func.func @transform_4(%arg0: i32) -> (i32, i32) {
    %c0_i32 = arith.constant 0 : i32
    %c0_i32_0 = arith.constant 0 : i32
    %c0_i32_1 = arith.constant 0 : i32
    return %c0_i32, %c0_i32_0 : i32, i32
  }
  func.func @transform_5(%arg0: i32) -> (i32, i32) {
    %c0_i32 = arith.constant 0 : i32
    %c0_i32_0 = arith.constant 0 : i32
    %c0_i32_1 = arith.constant 0 : i32
    return %c0_i32, %c0_i32_0 : i32, i32
  }
  func.func @transform_6(%arg0: i32) -> (i32, i32) {
    %c0_i32 = arith.constant 0 : i32
    %c0_i32_0 = arith.constant 0 : i32
    %c0_i32_1 = arith.constant 0 : i32
    return %c0_i32, %c0_i32_0 : i32, i32
  }
  func.func @transform_7(%arg0: i32) -> (i32, i32) {
    %c0_i32 = arith.constant 0 : i32
    %c0_i32_0 = arith.constant 0 : i32
    return %arg0, %c0_i32 : i32, i32
  }
}

</mosaic_0001>

<bundles_post_ra>
// kernel: _actor_forward.1
= control target key start
LH: loop header
LB: loop body
LE: loop exit
PB: predicated region body
PF: predicated region fallthrough
CT: control target
= control target key end

     0   :  { %12 = vsyncpa [#allocation3], 0  ;;  %s456_s0 = inlined_call_operand.hbm [shape: f32[2,16], index: 0, kind: input, shape index: {}]   ;;  %s457_s1 = inlined_call_operand.hbm [shape: f32[16,128], index: 1, kind: input, shape index: {}]   ;;  %s458_s2 = inlined_call_operand.vmem [shape: f32[1,128], index: 2, kind: input, shape index: {}]   ;;  %s459_s3 = inlined_call_operand.hbm [shape: f32[128,128], index: 3, kind: input, shape index: {}]   ;;  %s460_s4 = inlined_call_operand.vmem [shape: f32[1,128], index: 4, kind: input, shape index: {}]   ;;  %s461_s5 = inlined_call_operand.hbm [shape: f32[128,128], index: 5, kind: input, shape index: {}]   ;;  %s462_s6 = inlined_call_operand.vmem [shape: f32[1,128], index: 6, kind: input, shape index: {}]   ;;  %s463_s7 = inlined_call_operand.hbm [shape: f32[2,128], index: 7, kind: output, shape index: {}]  }
   0x1   :  { %13 = vsyncpa [#allocation6], 0 }
   0x2   :  { %14 = vsyncpa [#allocation9], 0  ;;  %s31_s26 = sshll.u32 %s457_s1, 4  ;;  %s32_s26 = int_to_ptr.hbm [resolvable:$true] %s31_s26 }
   0x3   :  { %15 = vsyncpa [#allocation4], 0  ;;  %s385_s27 = smov [#allocation5]   ;;  %s21_s8 = sshll.u32 %s456_s0, 4  ;;  %s22_s8 = int_to_ptr.hbm [resolvable:$true] %s21_s8 }
   0x4   :  { %s33_s28 = sshll.u32 %s385_s27, 4  ;;  %s386_s9 = smov 128   ;;  %s34_s28 = int_to_ptr.vmem [resolvable:$true] %s33_s28 }
   0x5   :  { %s387_s10 = smov 8   ;;  %s388_s11 = smov [#allocation2]  }
   0x6   :  { %39 = dma.hbm_to_vmem [thread:$0]  %s32_s26, 256, %s34_s28, [#allocation6], %s386_s9, %s386_s9, %s387_s10  }
   0x7   :  { %s23_s12 = sshll.u32 %s388_s11, 4  ;;  %s46_s15 = sshll.u32 %s459_s3, 4  ;;  %s24_s12 = int_to_ptr.vmem [resolvable:$true] %s23_s12  ;;  %s47_s15 = int_to_ptr.hbm [resolvable:$true] %s46_s15 }
   0x8   :  { %26 = dma.hbm_to_vmem [thread:$0]  %s22_s8, 32, %s24_s12, [#allocation3]  }
   0x9   :  { %s61_s17 = sshll.u32 %s461_s5, 4  ;;  %s389_s18 = smov [#allocation7]   ;;  %s62_s17 = int_to_ptr.hbm [resolvable:$true] %s61_s17 }
   0xa   :  { %s48_s19 = sshll.u32 %s389_s18, 4  ;;  %s390_s0 = smov [#allocation8]   ;;  %s49_s19 = int_to_ptr.vmem [resolvable:$true] %s48_s19 }
   0xb   :  { %54 = dma.hbm_to_vmem [thread:$0]  %s47_s15, 2048, %s49_s19, [#allocation6], %s386_s9, %s386_s9, %s387_s10  }
   0xc   :  { %s63_s20 = sshll.u32 %s390_s0, 4  ;;  %s64_s20 = int_to_ptr.vmem [resolvable:$true] %s63_s20 }
   0xd   :  { %69 = dma.hbm_to_vmem [thread:$0]  %s62_s17, 2048, %s64_s20, [#allocation9], %s386_s9, %s386_s9, %s387_s10  }
   0xe   :  { %377 = dma.done.wait [#allocation3], 32  }
   0xf   :  { %378 = vsyncadd [#allocation3], 4294967264 }
  0x10   :  { %379 = dma.done.wait [#allocation6], 2304  }
  0x11   :  { %380 = vsyncadd [#allocation6], 4294964992 }
  0x12   :  { %381 = dma.done.wait [#allocation9], 2048  }
  0x13   :  { %382 = vsyncadd [#allocation9], 4294965248  ;;  %v90_v0 = vld [vmem:[#allocation5 + $0x8] sm:$0xff]  ;;  %v89_v1 = vld [vmem:[#allocation5] sm:$0xff]  ;;  %vm95_vm0 = vcmask 130048  }
  0x14   :  { %113 = vmatpush.msra.mxu0 %v90_v0  ;;  %v88_v2 = vld [vmem:[#allocation2] sm:$0x3]  ;;  %v135_v3 = vld [vmem:[#allocation7 + $0x78] sm:$0xff]  ;;  %v134_v4 = vld [vmem:[#allocation7 + $0x70] sm:$0xff] }
  0x15   :  { %140 = vmatpush.msra.mxu1 %v135_v3  ;;  %v133_v5 = vld [vmem:[#allocation7 + $0x68] sm:$0xff]  ;;  %v132_v6 = vld [vmem:[#allocation7 + $0x60] sm:$0xff]  ;;  %v131_v7 = vld [vmem:[#allocation7 + $0x58] sm:$0xff] }
  0x16   :  { %114 = vmatpush.msra.mxu0 %v89_v1  ;;  %v130_v8 = vld [vmem:[#allocation7 + $0x50] sm:$0xff]  ;;  %v129_v9 = vld [vmem:[#allocation7 + $0x48] sm:$0xff]  ;;  %v128_v10 = vld [vmem:[#allocation7 + $0x40] sm:$0xff] }
  0x17   :  { %241 = vmatmul.msk.f32.vlgmr.msra.gmra.mxu0 %vm95_vm0, %v88_v2  ;;  %141 = vmatpush.msra.mxu1 %v134_v4  ;;  %v127_v11 = vld [vmem:[#allocation7 + $0x38] sm:$0xff]  ;;  %v126_v12 = vld [vmem:[#allocation7 + $0x30] sm:$0xff]  ;;  %v125_v13 = vld [vmem:[#allocation7 + $0x28] sm:$0xff] }
  0x18   :  { %v124_v14 = vld [vmem:[#allocation7 + $0x20] sm:$0xff]  ;;  %v123_v15 = vld [vmem:[#allocation7 + $0x18] sm:$0xff]  ;;  %v122_v16 = vld [vmem:[#allocation7 + $0x10] sm:$0xff] }
  0x19   :  { %142 = vmatpush.msra.mxu1 %v133_v5  ;;  %v121_v17 = vld [vmem:[#allocation7 + $0x8] sm:$0xff]  ;;  %v120_v18 = vld [vmem:[#allocation7] sm:$0xff]  ;;  %v176_v19 = vld [vmem:[#allocation8 + $0x78] sm:$0xff] }
  0x1a   :  { %v175_v20 = vld [vmem:[#allocation8 + $0x70] sm:$0xff]  ;;  %181 = vmatpush.msra.mxu2 %v176_v19  ;;  %v174_v21 = vld [vmem:[#allocation8 + $0x68] sm:$0xff]  ;;  %v173_v22 = vld [vmem:[#allocation8 + $0x60] sm:$0xff] }
  0x1b   :  { %143 = vmatpush.msra.mxu1 %v132_v6  ;;  %v172_v23 = vld [vmem:[#allocation8 + $0x58] sm:$0xff]  ;;  %v171_v24 = vld [vmem:[#allocation8 + $0x50] sm:$0xff]  ;;  %v170_v25 = vld [vmem:[#allocation8 + $0x48] sm:$0xff] }
  0x1c   :  { %182 = vmatpush.msra.mxu2 %v175_v20  ;;  %v169_v26 = vld [vmem:[#allocation8 + $0x40] sm:$0xff]  ;;  %v168_v27 = vld [vmem:[#allocation8 + $0x38] sm:$0xff]  ;;  %v167_v28 = vld [vmem:[#allocation8 + $0x30] sm:$0xff] }
  0x1d   :  { %144 = vmatpush.msra.mxu1 %v131_v7  ;;  %v166_v29 = vld [vmem:[#allocation8 + $0x28] sm:$0xff]  ;;  %v165_v30 = vld [vmem:[#allocation8 + $0x20] sm:$0xff]  ;;  %v164_v31 = vld [vmem:[#allocation8 + $0x18] sm:$0xff] }
  0x1e   :  { %183 = vmatpush.msra.mxu2 %v174_v21  ;;  %v250_v32 = vld [vmem:[%s458_s2] ss:$0 sm:$0xff]  ;;  %v163_v36 = vld [vmem:[#allocation8 + $0x10] sm:$0xff]  ;;  %v161_v38 = vld [vmem:[#allocation8] sm:$0xff] }
  0x1f   :  { %145 = vmatpush.msra.mxu1 %v130_v8  ;;  %v162_v37 = vld [vmem:[#allocation8 + $0x8] sm:$0xff] }
  0x20   :  { %184 = vmatpush.msra.mxu2 %v173_v22  ;;  %v251_v39 = vld [vmem:[%s460_s4] ss:$0 sm:$0xff]  ;;  %s391_s4 = smov [#allocation10]  }
  0x21   :  { %146 = vmatpush.msra.mxu1 %v129_v9  ;;  %v252_v43 = vld [vmem:[%s462_s6] ss:$0 sm:$0xff]  ;;  %s227_s24 = sshll.u32 %s391_s4, 4  ;;  %s229_s6 = sshll.u32 %s463_s7, 4  ;;  %s228_s24 = int_to_ptr.vmem [resolvable:$true] %s227_s24  ;;  %s230_s6 = int_to_ptr.hbm [resolvable:$true] %s229_s6 }
  0x22   :  { %185 = vmatpush.msra.mxu2 %v172_v23 }
  0x23   :  { %147 = vmatpush.msra.mxu1 %v128_v10 }
  0x24   :  { %186 = vmatpush.msra.mxu2 %v171_v24 }
  0x25   :  { %148 = vmatpush.msra.mxu1 %v127_v11 }
  0x26   :  { %187 = vmatpush.msra.mxu2 %v170_v25 }
  0x27   :  { %149 = vmatpush.msra.mxu1 %v126_v12 }
  0x28   :  { %188 = vmatpush.msra.mxu2 %v169_v26 }
  0x29   :  { %150 = vmatpush.msra.mxu1 %v125_v13 }
  0x2a   :  { %189 = vmatpush.msra.mxu2 %v168_v27 }
  0x2b   :  { %151 = vmatpush.msra.mxu1 %v124_v14 }
  0x2c   :  { %190 = vmatpush.msra.mxu2 %v167_v28 }
  0x2d   :  { %152 = vmatpush.msra.mxu1 %v123_v15 }
  0x2e   :  { %191 = vmatpush.msra.mxu2 %v166_v29 }
  0x2f   :  { %153 = vmatpush.msra.mxu1 %v122_v16 }
  0x30   :  { %192 = vmatpush.msra.mxu2 %v165_v30 }
  0x31   :  { %154 = vmatpush.msra.mxu1 %v121_v17 }
  0x32   :  { %193 = vmatpush.msra.mxu2 %v164_v31 }
  0x33   :  { %155 = vmatpush.msra.mxu1 %v120_v18 }
  0x34   :  { %194 = vmatpush.msra.mxu2 %v163_v36 }
  0x36   :  { %195 = vmatpush.msra.mxu2 %v162_v37 }
  0x38   :  { %196 = vmatpush.msra.mxu2 %v161_v38 }
  0x94   :  { %v116_v33 = vpop.f32.mrf.mxu0 }
  0x95   :  { %v117_v34 = vadd.f32 %v250_v32, %v116_v33 }
  0x97   :  { %v119_v35 = vmax.f32 %v117_v34, 0.0 }
  0x99   :  { %156 = vmatmul.f32.vlgmr.msra.gmra.mxu1 %v119_v35 }
 0x116   :  { %v157_v40 = vpop.f32.mrf.mxu1 }
 0x117   :  { %v158_v41 = vadd.f32 %v251_v39, %v157_v40 }
 0x119   :  { %v160_v42 = vmax.f32 %v158_v41, 0.0 }
 0x11b   :  { %197 = vmatmul.f32.vlgmr.msra.gmra.mxu2 %v160_v42 }
 0x19e   :  { %v198_v44 = vpop.f32.mrf.mxu2 }
 0x19f   :  { %v199_v45 = vadd.f32 %v252_v43, %v198_v44 }
 0x1a1   :  { %v242_v46 = vmul.f32 -2.0, %v199_v45 }
 0x1a3   :  { %v203_v47 = vmul.f32 1.442695, %v242_v46 }
 0x1a5   :  { %253 = vpow2.f32 %v203_v47 }
 0x1ab   :  { %v254_v48 = vpop.eup %253 }
 0x1ac   :  { %v205_v49 = vadd.f32 1.0, %v254_v48 }
 0x1ae   :  { %255 = vrcp.f32 %v205_v49  ;;  %v217_v53 = vand.u32 2147483648, %v205_v49  ;;  %v215_v55 = vand.u32 2147483647, %v205_v49  ;;  %vm211_vm2 = vweird.f32 %v205_v49 }
 0x1b0   :  { %v218_v57 = vor.u32 1.1754944e-38, %v217_v53  ;;  %vm216_vm4 = vcmp.eq.f32.partialorder %v215_v55, 8.507059e+37 }
 0x1b4   :  { %v256_v50 = vpop.eup %255 }
 0x1b5   :  { %v207_v51 = vmul.f32 %v256_v50, %v205_v49  ;;  %vm212_vm1 = vweird.f32 %v256_v50 }
 0x1b6   :  { %vm213_vm3 = vmor %vm211_vm2, %vm212_vm1 }
 0x1b7   :  { %v208_v52 = vsub.f32 1.0, %v207_v51 }
 0x1b9   :  { %v209_v54 = vmul.f32 %v256_v50, %v208_v52 }
 0x1bb   :  { %v210_v56 = vadd.f32 %v256_v50, %v209_v54 }
 0x1bd   :  { %v214_v58 = vsel %vm213_vm3, %v256_v50, %v210_v56 }
 0x1be   :  { %v219_v59 = vsel %vm216_vm4, %v218_v57, %v214_v58 }
 0x1bf   :  { %221 = vst [vmem:[#allocation10] sm:$0x3] %v219_v59 }
 0x1c0   :  { %232 = dma.vmem_to_hbm [thread:$0]  %s228_s24, 32, %s230_s6, [#allocation4]  }
 0x1c1   :  { %383 = dma.done.wait [#allocation4], 32  }
 0x1c2   :  { %384 = vsyncadd [#allocation4], 4294967264 }
 0x1c3   :  { %237 = vsyncpa [#allocation3], 1 }
 0x1c4   :  { %238 = vsyncpa [#allocation6], 1 }
 0x1c5   :  { %239 = vsyncpa [#allocation9], 1 }
 0x1c6   :  { %240 = vsyncpa [#allocation4], 1 }

// kernel: _actor_forward.1
= control target key start
LH: loop header
LB: loop body
LE: loop exit
PB: predicated region body
PF: predicated region fallthrough
CT: control target
= control target key end

     0   :  { %12 = vsyncpa [#allocation3], 0  ;;  %s456_s0 = inlined_call_operand.hbm [shape: f32[2,16], index: 0, kind: input, shape index: {}]   ;;  %s457_s1 = inlined_call_operand.hbm [shape: f32[16,128], index: 1, kind: input, shape index: {}]   ;;  %s458_s2 = inlined_call_operand.vmem [shape: f32[1,128], index: 2, kind: input, shape index: {}]   ;;  %s459_s3 = inlined_call_operand.hbm [shape: f32[128,128], index: 3, kind: input, shape index: {}]   ;;  %s460_s4 = inlined_call_operand.vmem [shape: f32[1,128], index: 4, kind: input, shape index: {}]   ;;  %s461_s5 = inlined_call_operand.hbm [shape: f32[128,128], index: 5, kind: input, shape index: {}]   ;;  %s462_s6 = inlined_call_operand.vmem [shape: f32[1,128], index: 6, kind: input, shape index: {}]   ;;  %s463_s7 = inlined_call_operand.hbm [shape: f32[2,128], index: 7, kind: output, shape index: {}]  }
   0x1   :  { %13 = vsyncpa [#allocation6], 0 }
   0x2   :  { %14 = vsyncpa [#allocation9], 0  ;;  %s31_s26 = sshll.u32 %s457_s1, 4  ;;  %s32_s26 = int_to_ptr.hbm [resolvable:$true] %s31_s26 }
   0x3   :  { %15 = vsyncpa [#allocation4], 0  ;;  %s385_s27 = smov [#allocation5]   ;;  %s21_s8 = sshll.u32 %s456_s0, 4  ;;  %s22_s8 = int_to_ptr.hbm [resolvable:$true] %s21_s8 }
   0x4   :  { %s33_s28 = sshll.u32 %s385_s27, 4  ;;  %s386_s9 = smov 128   ;;  %s34_s28 = int_to_ptr.vmem [resolvable:$true] %s33_s28 }
   0x5   :  { %s387_s10 = smov 8   ;;  %s388_s11 = smov [#allocation2]  }
   0x6   :  { %39 = dma.hbm_to_vmem [thread:$0]  %s32_s26, 256, %s34_s28, [#allocation6], %s386_s9, %s386_s9, %s387_s10  }
   0x7   :  { %s23_s12 = sshll.u32 %s388_s11, 4  ;;  %s46_s15 = sshll.u32 %s459_s3, 4  ;;  %s24_s12 = int_to_ptr.vmem [resolvable:$true] %s23_s12  ;;  %s47_s15 = int_to_ptr.hbm [resolvable:$true] %s46_s15 }
   0x8   :  { %26 = dma.hbm_to_vmem [thread:$0]  %s22_s8, 32, %s24_s12, [#allocation3]  }
   0x9   :  { %s61_s17 = sshll.u32 %s461_s5, 4  ;;  %s389_s18 = smov [#allocation7]   ;;  %s62_s17 = int_to_ptr.hbm [resolvable:$true] %s61_s17 }
   0xa   :  { %s48_s19 = sshll.u32 %s389_s18, 4  ;;  %s390_s0 = smov [#allocation8]   ;;  %s49_s19 = int_to_ptr.vmem [resolvable:$true] %s48_s19 }
   0xb   :  { %54 = dma.hbm_to_vmem [thread:$0]  %s47_s15, 2048, %s49_s19, [#allocation6], %s386_s9, %s386_s9, %s387_s10  }
   0xc   :  { %s63_s20 = sshll.u32 %s390_s0, 4  ;;  %s64_s20 = int_to_ptr.vmem [resolvable:$true] %s63_s20 }
   0xd   :  { %69 = dma.hbm_to_vmem [thread:$0]  %s62_s17, 2048, %s64_s20, [#allocation9], %s386_s9, %s386_s9, %s387_s10  }
   0xe   :  { %377 = dma.done.wait [#allocation3], 32  }
   0xf   :  { %378 = vsyncadd [#allocation3], 4294967264 }
  0x10   :  { %379 = dma.done.wait [#allocation6], 2304  }
  0x11   :  { %380 = vsyncadd [#allocation6], 4294964992 }
  0x12   :  { %381 = dma.done.wait [#allocation9], 2048  }
  0x13   :  { %382 = vsyncadd [#allocation9], 4294965248  ;;  %v90_v0 = vld [vmem:[#allocation5 + $0x8] sm:$0xff]  ;;  %v89_v1 = vld [vmem:[#allocation5] sm:$0xff]  ;;  %vm95_vm0 = vcmask 130048  }
  0x14   :  { %113 = vmatpush.msra.mxu0 %v90_v0  ;;  %v88_v2 = vld [vmem:[#allocation2] sm:$0x3]  ;;  %v135_v3 = vld [vmem:[#allocation7 + $0x78] sm:$0xff]  ;;  %v134_v4 = vld [vmem:[#allocation7 + $0x70] sm:$0xff] }
  0x15   :  { %140 = vmatpush.msra.mxu1 %v135_v3  ;;  %v133_v5 = vld [vmem:[#allocation7 + $0x68] sm:$0xff]  ;;  %v132_v6 = vld [vmem:[#allocation7 + $0x60] sm:$0xff]  ;;  %v131_v7 = vld [vmem:[#allocation7 + $0x58] sm:$0xff] }
  0x16   :  { %114 = vmatpush.msra.mxu0 %v89_v1  ;;  %v130_v8 = vld [vmem:[#allocation7 + $0x50] sm:$0xff]  ;;  %v129_v9 = vld [vmem:[#allocation7 + $0x48] sm:$0xff]  ;;  %v128_v10 = vld [vmem:[#allocation7 + $0x40] sm:$0xff] }
  0x17   :  { %241 = vmatmul.msk.f32.vlgmr.msra.gmra.mxu0 %vm95_vm0, %v88_v2  ;;  %141 = vmatpush.msra.mxu1 %v134_v4  ;;  %v127_v11 = vld [vmem:[#allocation7 + $0x38] sm:$0xff]  ;;  %v126_v12 = vld [vmem:[#allocation7 + $0x30] sm:$0xff]  ;;  %v125_v13 = vld [vmem:[#allocation7 + $0x28] sm:$0xff] }
  0x18   :  { %v124_v14 = vld [vmem:[#allocation7 + $0x20] sm:$0xff]  ;;  %v123_v15 = vld [vmem:[#allocation7 + $0x18] sm:$0xff]  ;;  %v122_v16 = vld [vmem:[#allocation7 + $0x10] sm:$0xff] }
  0x19   :  { %142 = vmatpush.msra.mxu1 %v133_v5  ;;  %v121_v17 = vld [vmem:[#allocation7 + $0x8] sm:$0xff]  ;;  %v120_v18 = vld [vmem:[#allocation7] sm:$0xff]  ;;  %v176_v19 = vld [vmem:[#allocation8 + $0x78] sm:$0xff] }
  0x1a   :  { %v175_v20 = vld [vmem:[#allocation8 + $0x70] sm:$0xff]  ;;  %181 = vmatpush.msra.mxu2 %v176_v19  ;;  %v174_v21 = vld [vmem:[#allocation8 + $0x68] sm:$0xff]  ;;  %v173_v22 = vld [vmem:[#allocation8 + $0x60] sm:$0xff] }
  0x1b   :  { %143 = vmatpush.msra.mxu1 %v132_v6  ;;  %v172_v23 = vld [vmem:[#allocation8 + $0x58] sm:$0xff]  ;;  %v171_v24 = vld [vmem:[#allocation8 + $0x50] sm:$0xff]  ;;  %v170_v25 = vld [vmem:[#allocation8 + $0x48] sm:$0xff] }
  0x1c   :  { %182 = vmatpush.msra.mxu2 %v175_v20  ;;  %v169_v26 = vld [vmem:[#allocation8 + $0x40] sm:$0xff]  ;;  %v168_v27 = vld [vmem:[#allocation8 + $0x38] sm:$0xff]  ;;  %v167_v28 = vld [vmem:[#allocation8 + $0x30] sm:$0xff] }
  0x1d   :  { %144 = vmatpush.msra.mxu1 %v131_v7  ;;  %v166_v29 = vld [vmem:[#allocation8 + $0x28] sm:$0xff]  ;;  %v165_v30 = vld [vmem:[#allocation8 + $0x20] sm:$0xff]  ;;  %v164_v31 = vld [vmem:[#allocation8 + $0x18] sm:$0xff] }
  0x1e   :  { %183 = vmatpush.msra.mxu2 %v174_v21  ;;  %v250_v32 = vld [vmem:[%s458_s2] ss:$0 sm:$0xff]  ;;  %v163_v36 = vld [vmem:[#allocation8 + $0x10] sm:$0xff]  ;;  %v161_v38 = vld [vmem:[#allocation8] sm:$0xff] }
  0x1f   :  { %145 = vmatpush.msra.mxu1 %v130_v8  ;;  %v162_v37 = vld [vmem:[#allocation8 + $0x8] sm:$0xff] }
  0x20   :  { %184 = vmatpush.msra.mxu2 %v173_v22  ;;  %v251_v39 = vld [vmem:[%s460_s4] ss:$0 sm:$0xff]  ;;  %s391_s4 = smov [#allocation10]  }
  0x21   :  { %146 = vmatpush.msra.mxu1 %v129_v9  ;;  %v252_v43 = vld [vmem:[%s462_s6] ss:$0 sm:$0xff]  ;;  %s227_s24 = sshll.u32 %s391_s4, 4  ;;  %s229_s6 = sshll.u32 %s463_s7, 4  ;;  %s228_s24 = int_to_ptr.vmem [resolvable:$true] %s227_s24  ;;  %s230_s6 = int_to_ptr.hbm [resolvable:$true] %s229_s6 }
  0x22   :  { %185 = vmatpush.msra.mxu2 %v172_v23 }
  0x23   :  { %147 = vmatpush.msra.mxu1 %v128_v10 }
  0x24   :  { %186 = vmatpush.msra.mxu2 %v171_v24 }
  0x25   :  { %148 = vmatpush.msra.mxu1 %v127_v11 }
  0x26   :  { %187 = vmatpush.msra.mxu2 %v170_v25 }
  0x27   :  { %149 = vmatpush.msra.mxu1 %v126_v12 }
  0x28   :  { %188 = vmatpush.msra.mxu2 %v169_v26 }
  0x29   :  { %150 = vmatpush.msra.mxu1 %v125_v13 }
  0x2a   :  { %189 = vmatpush.msra.mxu2 %v168_v27 }
  0x2b   :  { %151 = vmatpush.msra.mxu1 %v124_v14 }
  0x2c   :  { %190 = vmatpush.msra.mxu2 %v167_v28 }
  0x2d   :  { %152 = vmatpush.msra.mxu1 %v123_v15 }
  0x2e   :  { %191 = vmatpush.msra.mxu2 %v166_v29 }
  0x2f   :  { %153 = vmatpush.msra.mxu1 %v122_v16 }
  0x30   :  { %192 = vmatpush.msra.mxu2 %v165_v30 }
  0x31   :  { %154 = vmatpush.msra.mxu1 %v121_v17 }
  0x32   :  { %193 = vmatpush.msra.mxu2 %v164_v31 }
  0x33   :  { %155 = vmatpush.msra.mxu1 %v120_v18 }
  0x34   :  { %194 = vmatpush.msra.mxu2 %v163_v36 }
  0x36   :  { %195 = vmatpush.msra.mxu2 %v162_v37 }
  0x38   :  { %196 = vmatpush.msra.mxu2 %v161_v38 }
  0x94   :  { %v116_v33 = vpop.f32.mrf.mxu0 }
  0x95   :  { %v117_v34 = vadd.f32 %v250_v32, %v116_v33 }
  0x97   :  { %v119_v35 = vmax.f32 %v117_v34, 0.0 }
  0x99   :  { %156 = vmatmul.f32.vlgmr.msra.gmra.mxu1 %v119_v35 }
 0x116   :  { %v157_v40 = vpop.f32.mrf.mxu1 }
 0x117   :  { %v158_v41 = vadd.f32 %v251_v39, %v157_v40 }
 0x119   :  { %v160_v42 = vmax.f32 %v158_v41, 0.0 }
 0x11b   :  { %197 = vmatmul.f32.vlgmr.msra.gmra.mxu2 %v160_v42 }
 0x19e   :  { %v198_v44 = vpop.f32.mrf.mxu2 }
 0x19f   :  { %v199_v45 = vadd.f32 %v252_v43, %v198_v44 }
 0x1a1   :  { %v242_v46 = vmul.f32 -2.0, %v199_v45 }
 0x1a3   :  { %v203_v47 = vmul.f32 1.442695, %v242_v46 }
 0x1a5   :  { %253 = vpow2.f32 %v203_v47 }
 0x1ab   :  { %v254_v48 = vpop.eup %253 }
 0x1ac   :  { %v205_v49 = vadd.f32 1.0, %v254_v48 }
 0x1ae   :  { %255 = vrcp.f32 %v205_v49  ;;  %v217_v53 = vand.u32 2147483648, %v205_v49  ;;  %v215_v55 = vand.u32 2147483647, %v205_v49  ;;  %vm211_vm2 = vweird.f32 %v205_v49 }
 0x1b0   :  { %v218_v57 = vor.u32 1.1754944e-38, %v217_v53  ;;  %vm216_vm4 = vcmp.eq.f32.partialorder %v215_v55, 8.507059e+37 }
 0x1b4   :  { %v256_v50 = vpop.eup %255 }
 0x1b5   :  { %v207_v51 = vmul.f32 %v256_v50, %v205_v49  ;;  %vm212_vm1 = vweird.f32 %v256_v50 }
 0x1b6   :  { %vm213_vm3 = vmor %vm211_vm2, %vm212_vm1 }
 0x1b7   :  { %v208_v52 = vsub.f32 1.0, %v207_v51 }
 0x1b9   :  { %v209_v54 = vmul.f32 %v256_v50, %v208_v52 }
 0x1bb   :  { %v210_v56 = vadd.f32 %v256_v50, %v209_v54 }
 0x1bd   :  { %v214_v58 = vsel %vm213_vm3, %v256_v50, %v210_v56 }
 0x1be   :  { %v219_v59 = vsel %vm216_vm4, %v218_v57, %v214_v58 }
 0x1bf   :  { %221 = vst [vmem:[#allocation10] sm:$0x3] %v219_v59 }
 0x1c0   :  { %232 = dma.vmem_to_hbm [thread:$0]  %s228_s24, 32, %s230_s6, [#allocation4]  }
 0x1c1   :  { %383 = dma.done.wait [#allocation4], 32  }
 0x1c2   :  { %384 = vsyncadd [#allocation4], 4294967264 }
 0x1c3   :  { %237 = vsyncpa [#allocation3], 1 }
 0x1c4   :  { %238 = vsyncpa [#allocation6], 1 }
 0x1c5   :  { %239 = vsyncpa [#allocation9], 1 }
 0x1c6   :  { %240 = vsyncpa [#allocation4], 1 }

</bundles_post_ra>
